<compile_context>
chip_gen: v6e
topology: v6e:2x2x1
jax: 0.10.0
libtpu: 0.0.40
codegen_flags: <defaults>
</compile_context>

<pallas_src>
import functools

import jax
import jax.numpy as jnp
from jax.experimental import pallas as pl
from jax.experimental.pallas import tpu as pltpu


def _round_up(x: int, m: int) -> int:
    return ((x + m - 1) // m) * m


def _sublane_multiple(dtype) -> int:
    # 8 for f32, 16 for bf16, 32 for int8/fp8 (sub-32-bit packs along sublanes).
    itemsize = jnp.dtype(dtype).itemsize
    return max(8, 32 // max(itemsize, 1))


# -------------------------- kernels --------------------------------------


def _resident_w_kernel(x_ref, w_ref, o_ref):
    """Weight fully VMEM-resident: one MXU call per batch tile."""
    o_ref[...] = jnp.dot(
        x_ref[...], w_ref[...], preferred_element_type=jnp.float32
    ).astype(o_ref.dtype)


def _tiled_kernel_acc_in_out(x_ref, w_ref, o_ref):
    """Tiled matmul, f32 output: accumulate directly into the resident o block."""
    @pl.when(pl.program_id(2) == 0)
    def _init():
        o_ref[...] = jnp.zeros_like(o_ref)

    o_ref[...] += jnp.dot(
        x_ref[...], w_ref[...], preferred_element_type=jnp.float32
    )


def _tiled_kernel_scratch(x_ref, w_ref, o_ref, acc_ref):
    """Tiled matmul for narrow output dtypes: f32 scratch accumulator."""
    @pl.when(pl.program_id(2) == 0)
    def _init():
        acc_ref[...] = jnp.zeros_like(acc_ref)

    acc_ref[...] += jnp.dot(
        x_ref[...], w_ref[...], preferred_element_type=jnp.float32
    )

    @pl.when(pl.program_id(2) == pl.num_programs(2) - 1)
    def _finalize():
        o_ref[...] = acc_ref[...].astype(o_ref.dtype)


# -------------------------- wrapper --------------------------------------

# Keep tiles well below v7x's 64 MiB/TC VMEM (leave headroom for Mosaic
# internal scratch + semaphores); v5e/v6e have 128 MiB so this is safe there.
_VMEM_TILE_CAP = 40 * 1024 * 1024
_VMEM_LIMIT_CAP = 48 * 1024 * 1024
_FAST_PATH_W_BYTES = 6 * 1024 * 1024


@functools.partial(
    jax.jit,
    static_argnames=("block_batch", "block_n", "block_k", "cast_to_bf16"),
)
def party_forward(x, w, *, block_batch=512, block_n=1024, block_k=1024,
                  cast_to_bf16=False):
    """Pallas implementation of Party.forward: x @ w."""
    batch, num_features = x.shape
    kf, num_output = w.shape
    assert kf == num_features, "x/w inner dimensions must match"

    out_dtype = jnp.result_type(x.dtype, w.dtype)
    if cast_to_bf16:
        # Accuracy-gated: MXU-native inputs, still f32 accumulation in-kernel.
        x = x.astype(jnp.bfloat16)
        w = w.astype(jnp.bfloat16)

    xb = jnp.dtype(x.dtype).itemsize
    wb = jnp.dtype(w.dtype).itemsize
    ob = jnp.dtype(out_dtype).itemsize
    sub_m = _sublane_multiple(x.dtype)

    # ======================= fast path: resident weight ====================
    w_vmem_bytes = num_features * num_output * wb
    if w_vmem_bytes <= _FAST_PATH_W_BYTES:
        tm = batch if batch <= block_batch else _round_up(block_batch, sub_m)
        # Guarantee >=2 parallel blocks so both v7x TensorCores get work.
        if pl.cdiv(batch, tm) < 2 and batch >= 2 * sub_m:
            tm = _round_up(pl.cdiv(batch, 2), sub_m)

        def fast_bytes(tm_):
            # double-buffered x/out tiles + single-buffered resident weight
            return 2 * tm_ * (num_features * xb + num_output * ob) + w_vmem_bytes

        while tm > sub_m and fast_bytes(tm) > _VMEM_TILE_CAP:
            tm = max(sub_m, _round_up(tm // 2, sub_m))

        if fast_bytes(tm) <= _VMEM_TILE_CAP:
            grid = (pl.cdiv(batch, tm),)
            vmem_limit = min(
                _VMEM_LIMIT_CAP,
                max(fast_bytes(tm) + 4 * 1024 * 1024, 16 * 1024 * 1024),
            )
            cost = pl.CostEstimate(
                flops=2 * batch * num_features * num_output,
                transcendentals=0,
                bytes_accessed=(
                    batch * num_features * xb
                    + num_features * num_output * wb
                    + batch * num_output * ob
                ),
            )
            return pl.pallas_call(
                _resident_w_kernel,
                out_shape=jax.ShapeDtypeStruct((batch, num_output), out_dtype),
                grid_spec=pltpu.PrefetchScalarGridSpec(
                    num_scalar_prefetch=0,
                    grid=grid,
                    in_specs=[
                        # x: streamed once over the batch axis.
                        pl.BlockSpec((tm, num_features), lambda i: (i, 0)),
                        # w: constant block index -> fetched once, stays in VMEM.
                        pl.BlockSpec(
                            (num_features, num_output), lambda i: (0, 0)
                        ),
                    ],
                    out_specs=pl.BlockSpec((tm, num_output), lambda i: (i, 0)),
                ),
                compiler_params=pltpu.CompilerParams(
                    dimension_semantics=("parallel",),
                    vmem_limit_bytes=vmem_limit,
                ),
                cost_estimate=cost,
            )(x, w)
        # else: fall through to the general tiled path.

    # ======================= general tiled path ============================
    # Tile sizes: full extent when the dim fits the block (always legal),
    # otherwise 256-aligned (MXU-friendly on v6e/v7x, 128-legal on v5e).
    tm = batch if batch <= block_batch else _round_up(block_batch, sub_m)
    tn = num_output if num_output <= block_n else _round_up(block_n, 256)
    tk = num_features if num_features <= block_k else _round_up(block_k, 256)

    # >=2 blocks on the parallel (i, j) axes for v7x megacore.
    if pl.cdiv(batch, tm) * pl.cdiv(num_output, tn) < 2 and batch >= 2 * sub_m:
        tm = _round_up(pl.cdiv(batch, 2), sub_m)

    acc_in_out = out_dtype == jnp.float32

    def general_bytes(tm_, tn_, tk_):
        ws = 2 * (tm_ * tk_ * xb + tk_ * tn_ * wb + tm_ * tn_ * ob)
        if not acc_in_out:
            ws += tm_ * tn_ * 4  # f32 scratch accumulator
        return ws

    # Shrink (rarely triggered with the defaults: ~18 MiB f32 working set).
    while general_bytes(tm, tn, tk) > _VMEM_TILE_CAP:
        if tk >= 512 and tk % 512 == 0:
            tk //= 2
        elif tn >= 512 and tn % 512 == 0:
            tn //= 2
        elif tm > sub_m:
            tm = max(sub_m, _round_up(tm // 2, sub_m))
        else:
            break

    # Only the reduction dim is ever zero-padded (M/N edges are masked by
    # Pallas; garbage along K would corrupt every output element).
    k_pad = _round_up(num_features, tk)
    x_p = x
    w_p = w
    if k_pad != num_features:
        x_p = jnp.pad(x, ((0, 0), (0, k_pad - num_features)))
        w_p = jnp.pad(w, ((0, k_pad - num_features), (0, 0)))

    grid = (pl.cdiv(batch, tm), pl.cdiv(num_output, tn), k_pad // tk)

    vmem_limit = min(
        _VMEM_LIMIT_CAP,
        max(general_bytes(tm, tn, tk) + 4 * 1024 * 1024, 16 * 1024 * 1024),
    )
    cost = pl.CostEstimate(
        flops=2 * batch * k_pad * num_output,
        transcendentals=0,
        bytes_accessed=(
            batch * k_pad * xb + k_pad * num_output * wb
            + batch * num_output * ob
        ),
    )

    in_specs = [
        pl.BlockSpec((tm, tk), lambda i, j, k: (i, k)),
        pl.BlockSpec((tk, tn), lambda i, j, k: (k, j)),
    ]
    out_spec = pl.BlockSpec((tm, tn), lambda i, j, k: (i, j))

    if acc_in_out:
        kernel = _tiled_kernel_acc_in_out
        scratch_shapes = []
    else:
        kernel = _tiled_kernel_scratch
        scratch_shapes = [pltpu.VMEM((tm, tn), jnp.float32)]

    return pl.pallas_call(
        kernel,
        out_shape=jax.ShapeDtypeStruct((batch, num_output), out_dtype),
        grid_spec=pltpu.PrefetchScalarGridSpec(
            num_scalar_prefetch=0,
            grid=grid,
            in_specs=in_specs,
            out_specs=out_spec,
            scratch_shapes=scratch_shapes,
        ),
        compiler_params=pltpu.CompilerParams(
            dimension_semantics=("parallel", "parallel", "arbitrary"),
            vmem_limit_bytes=vmem_limit,
        ),
        cost_estimate=cost,
    )(x_p, w_p)


def xavier_init(key, num_features, num_output, dtype=jnp.float32):
    """Matches Party.xavier_init: randn(size) * 1/sqrt(in_dim/2)."""
    stddev = 1.0 / jnp.sqrt(num_features / 2.0)
    return jax.random.normal(key, (num_features, num_output), dtype=dtype) * stddev


if __name__ == "__main__":
    # Small shapes consistent with the module's forward (pure linear layer).
    batch = 64
    num_features = 32
    num_output = 16

    key = jax.random.PRNGKey(0)
    kx, kw = jax.random.split(key)

    x = jax.random.normal(kx, (batch, num_features), dtype=jnp.float32)
    w = xavier_init(kw, num_features, num_output)

    out = party_forward(x, w)
    out = jax.block_until_ready(out)

    # Correctness check against plain-JAX reference of the same forward.
    ref = x @ w
    assert out.shape == (batch, num_output)
    assert jnp.allclose(out, ref, atol=1e-5, rtol=1e-5)

    # Exercise the general tiled path as well (K forced onto the grid).
    x2 = jax.random.normal(kx, (96, 300), dtype=jnp.float32)
    w2 = xavier_init(kw, 300, 136)
    out2 = jax.block_until_ready(
        party_forward(x2, w2, block_batch=64, block_n=128, block_k=128)
    )
    assert jnp.allclose(out2, x2 @ w2, atol=1e-4, rtol=1e-4)

    print("KERNEL_OK")
</pallas_src>

<mosaic_0001>
module attributes {stable_mosaic.version = 11 : i64} {
  func.func @_resident_w_kernel(%arg0: i32, %arg1: memref<32x32xf32, #tpu.memory_space<vmem>>, %arg2: memref<32x16xf32, #tpu.memory_space<vmem>>, %arg3: memref<32x16xf32, #tpu.memory_space<vmem>>) attributes {dimension_semantics = [#tpu.dimension_semantics<parallel>], iteration_bounds = array<i64: 2>, scalar_prefetch = 0 : i64, scratch_operands = 0 : i64, tpu.core_type = #tpu.core_type<tc>, window_params = [{transform_indices = @transform_0, window_bounds = array<i64: 32, 32>}, {pipeline_mode = #tpu.pipeline_mode<synchronous>, transform_indices = @transform_1, window_bounds = array<i64: 32, 16>}, {transform_indices = @transform_2, window_bounds = array<i64: 32, 16>}]} {
    %c0 = arith.constant 0 : index
    %c0_0 = arith.constant 0 : index
    %0 = vector.load %arg1[%c0, %c0_0] : memref<32x32xf32, #tpu.memory_space<vmem>>, vector<32x32xf32>
    %c0_1 = arith.constant 0 : index
    %c0_2 = arith.constant 0 : index
    %1 = vector.load %arg2[%c0_1, %c0_2] : memref<32x16xf32, #tpu.memory_space<vmem>>, vector<32x16xf32>
    %cst = arith.constant dense<0.000000e+00> : vector<32x16xf32>
    %2 = tpu.matmul %0, %1, %cst {dimension_numbers = #tpu.dot_dimension_numbers<[1], [0], [0], [1], [0, 0, 1, 1], [], []>} : vector<32x32xf32>, vector<32x16xf32>, vector<32x16xf32> -> vector<32x16xf32>
    %c0_3 = arith.constant 0 : index
    %c0_4 = arith.constant 0 : index
    %3 = vector.load %arg3[%c0_3, %c0_4] : memref<32x16xf32, #tpu.memory_space<vmem>>, vector<32x16xf32>
    tpu.vector_store %arg3[%c0_3, %c0_4], %2 {strides = array<i32>} : memref<32x16xf32, #tpu.memory_space<vmem>>, vector<32x16xf32>,
    return
  }
  func.func @transform_0(%arg0: i32) -> (i32, i32) {
    %c0_i32 = arith.constant 0 : i32
    %c0_i32_0 = arith.constant 0 : i32
    return %arg0, %c0_i32 : i32, i32
  }
  func.func @transform_1(%arg0: i32) -> (i32, i32) {
    %c0_i32 = arith.constant 0 : i32
    %c0_i32_0 = arith.constant 0 : i32
    %c0_i32_1 = arith.constant 0 : i32
    return %c0_i32, %c0_i32_0 : i32, i32
  }
  func.func @transform_2(%arg0: i32) -> (i32, i32) {
    %c0_i32 = arith.constant 0 : i32
    %c0_i32_0 = arith.constant 0 : i32
    return %arg0, %c0_i32 : i32, i32
  }
}

</mosaic_0001>

<bundles_post_ra>
// kernel: party_forward.1
= control target key start
LH: loop header
LB: loop body
LE: loop exit
PB: predicated region body
PF: predicated region fallthrough
CT: control target
= control target key end

     0   :  { %s390_s9 = smov 0   ;;  %s419_s0 = inlined_call_operand.vmem [shape: f32[64,32], index: 0, kind: input, shape index: {}]   ;;  %s420_s1 = inlined_call_operand.vmem [shape: f32[32,16], index: 1, kind: input, shape index: {}]   ;;  %s421_s2 = inlined_call_operand.vmem [shape: f32[64,16], index: 2, kind: output, shape index: {}]  }
   0x1 LB: > { %s314_s10 = sadd.s32 4294967295, %s373_s9   ;;  %p318_p0 = scmp.ge.s32.totalorder %s373_s9, 1  ;;  %s373_s9 = sphi %s390_s9, %s12_s9  }
   0x2   : > { %p113_p1 = scmp.lt.s32.totalorder %s373_s9, 3 }
   0x4   : > { %p114_p2 = pnand %p318_p0, %p113_p1 }
   0x5   : > { %s319_s15 = sshll.u32 (!%p114_p2), %s314_s10, 2 }
   0x6   : > { %117 = sbr.rel (%p114_p2) target bundleno = 217 (0xd9), region = 28  ;;  %p136_p3 = scmp.lt.s32.totalorder (!%p114_p2), %s319_s15, 7 }
   0xb   : > { %v154_v0 = vld [vmem:[%s420_s1 + $0x18] sm:$0xff]  ;;  %v153_v1 = vld [vmem:[%s420_s1 + $0x10] sm:$0xff]  ;;  %v152_v2 = vld [vmem:[%s420_s1 + $0x8] sm:$0xff]  ;;  %s423_s15 = smov (!%p136_p3, %s319_s15), 7  ;;  %vm155_vm0 = vcmask 261120   ;;  %vm253_vm1 = vcmask 130048  }
   0xc   : > { %337 = vmatprep.subr.mxu0 %v154_v0  ;;  %351 = vmatprep.subr.mxu1 %v154_v0  ;;  %v151_v3 = vld [vmem:[%s420_s1] sm:$0xff]  ;;  %s320_s20 = sshll.u32 %s423_s15, 3 }
   0xd   : > { %338 = vmatpush3.msra.mxu0 %v154_v0  ;;  %355 = vmatpush3.msra.mxu1 %v154_v0  ;;  %s139_s23 = scalar_lea.vmem %s419_s0, %s320_s20  ;;  %s145_s26 = scalar_lea.vmem %s421_s2, %s320_s20 }
   0xe   : > { %339 = vmatprep.subr.mxu0 %v153_v1  ;;  %352 = vmatprep.subr.mxu1 %v153_v1  ;;  %v147_v4 = vld [vmem:[%s139_s23] sm:$0xff]  ;;  %v149_v5 = vld [vmem:[%s139_s23 + $0x10] sm:$0xff]  ;;  %v148_v6 = vld [vmem:[%s139_s23 + $0x8] sm:$0xff] }
   0xf   : > { %340 = vmatpush3.msra.mxu0 %v153_v1  ;;  %356 = vmatpush3.msra.mxu1 %v153_v1  ;;  %v150_v7 = vld [vmem:[%s139_s23 + $0x18] sm:$0xff] }
  0x10   : > { %341 = vmatprep.subr.mxu0 %v152_v2  ;;  %353 = vmatprep.subr.mxu1 %v152_v2 }
  0x11   : > { %342 = vmatpush3.msra.mxu0 %v152_v2  ;;  %357 = vmatpush3.msra.mxu1 %v152_v2 }
  0x12   : > { %343 = vmatprep.subr.mxu0 %v151_v3  ;;  %354 = vmatprep.subr.mxu1 %v151_v3 }
  0x13   : > { %344 = vmatpush3.msra.mxu0 %v151_v3  ;;  %358 = vmatpush3.msra.mxu1 %v151_v3 }
  0x14   : > { %345 = vmatprep.mubr.msk.f32.mxu0 %vm155_vm0, %v147_v4  ;;  %348 = vmatprep.mubr.msk.f32.mxu1 %vm155_vm0, %v149_v5 }
  0x15   : > { %346 = vmatmul.mubr.msk.f32.vlgmr.msra.gmra.mxu0 %vm155_vm0, %v148_v6  ;;  %349 = vmatmul.mubr.msk.f32.vlgmr.msra.gmra.mxu1 %vm155_vm0, %v150_v7 }
  0xd5   : > { %v347_v8 = vpop.f32.mrf.mxu0  ;;  %v350_v9 = vpop.f32.mrf.mxu1 }
  0xd6   : > { %255 = vst.msk [vmem:[%s145_s26 + $0x8] sm:$0xff] %vm253_vm1, %v347_v8  ;;  %257 = vst.msk [vmem:[%s145_s26 + $0x18] sm:$0xff] %vm253_vm1, %v350_v9 }
  0xd7   : > { %v234_v10 = vpop.f32.mrf.mxu0  ;;  %v244_v11 = vpop.f32.mrf.mxu1 }
  0xd8   : > { %254 = vst.msk [vmem:[%s145_s26] sm:$0xff] %vm253_vm1, %v234_v10  ;;  %256 = vst.msk [vmem:[%s145_s26 + $0x10] sm:$0xff] %vm253_vm1, %v244_v11 }
  0xd9 PF: > { %s12_s9 = sadd.s32 1, %s373_s9  }
  0xda   : > { %p9_p4 = scmp.ge.s32.totalorder %s12_s9, 4  }
  0xdc   :  { %11 = sbr.rel (!%p9_p4) target bundleno = 1 (0x1), region = 58 }

</bundles_post_ra>
